<compile_context>
chip_gen: v7x
topology: tpu7x:2x2x1
jax: 0.10.0
libtpu: 0.0.40
codegen_flags: <defaults>
</compile_context>

<pallas_src>
import functools

import jax
import jax.numpy as jnp
from jax import lax
from jax.experimental import pallas as pl
from jax.experimental.pallas import tpu as pltpu


def self_attention_kernel(qkv_ref, wqkv_ref, wfc_ref, b_ref, o_ref, *,
                          heads, head_dim, embed, scale):
    """One batch element: fused q/k/v all-head projection, per-head softmax attn, fc_out."""
    # Single fused projection: (L, 3E) @ (3E, 3E) block-diag == per-head x @ W^T for q|k|v.
    proj = jnp.dot(qkv_ref[...], wqkv_ref[...],
                   preferred_element_type=jnp.float32)                     # (L, 3E) f32
    proj_b = proj.astype(jnp.bfloat16)

    head_outs = []
    for h in range(heads):  # static python loop -> fully unrolled, static lane slices
        qh = proj_b[:, h * head_dim:(h + 1) * head_dim]                    # (L, d) bf16
        kh = proj_b[:, embed + h * head_dim:embed + (h + 1) * head_dim]    # (L, d) bf16
        vh = proj_b[:, 2 * embed + h * head_dim:
                       2 * embed + (h + 1) * head_dim]                     # (L, d) bf16

        # scores: contract last dims directly (no explicit kh.T materialization).
        e = lax.dot_general(qh, kh, (((1,), (1,)), ((), ())),
                            preferred_element_type=jnp.float32) * scale    # (L, L) f32

        # Stable softmax, entirely in fp32 (v5e VPU/EUP have no bf16).
        e_max = jnp.max(e, axis=-1, keepdims=True)
        p = jnp.exp(e - e_max)
        denom = jnp.sum(p, axis=-1, keepdims=True)
        attn = p * pl.reciprocal(denom, approx=True)                       # EUP slot

        head_outs.append(jnp.dot(attn.astype(jnp.bfloat16), vh,
                                 preferred_element_type=jnp.float32))      # (L, d) f32

    concat = jnp.concatenate(head_outs, axis=-1)                           # (L, E) f32

    # fc_out epilogue: bf16 MXU matmul with fp32 accumulation, fused bias add.
    out = jnp.dot(concat.astype(jnp.bfloat16), wfc_ref[...],
                  preferred_element_type=jnp.float32) + b_ref[...]         # (L, E) f32
    o_ref[0] = out


def self_attention_pallas(values, keys, query, params, embed_size, heads):
    N, L, E = query.shape
    assert E == embed_size
    d = embed_size // heads

    # nn.Linear computes x @ W^T.  Build block-diagonal per-head weights, then stack
    # q/k/v into one (3E, 3E) block-diagonal so a single MXU matmul applies everything.
    eye_h = jnp.eye(heads, dtype=jnp.float32)
    wq_bd = jnp.kron(eye_h, params["wq"].T)                                # (E, E) f32
    wk_bd = jnp.kron(eye_h, params["wk"].T)                                # (E, E) f32
    wv_bd = jnp.kron(eye_h, params["wv"].T)                                # (E, E) f32
    wqkv = jax.scipy.linalg.block_diag(wq_bd, wk_bd, wv_bd).astype(jnp.bfloat16)  # (3E, 3E)
    wfc_t = params["wfc"].T.astype(jnp.bfloat16)                           # (E, E)
    b2 = params["b"].reshape(1, E).astype(jnp.float32)                     # (1, E)

    # Pre-concatenated bf16 activations: one input DMA per grid step, half the HBM traffic.
    qkv = jnp.concatenate([query, keys, values], axis=-1).astype(jnp.bfloat16)   # (N, L, 3E)

    kernel = functools.partial(self_attention_kernel, heads=heads, head_dim=d,
                               embed=embed_size, scale=1.0 / (embed_size ** 0.5))

    out = pl.pallas_call(
        kernel,
        out_shape=jax.ShapeDtypeStruct((N, L, E), jnp.float32),
        grid_spec=pltpu.PrefetchScalarGridSpec(
            num_scalar_prefetch=0,
            grid=(N,),
            in_specs=[
                pl.BlockSpec((pl.Squeezed(), L, 3 * E), lambda n: (n, 0, 0)),  # q|k|v
                pl.BlockSpec((3 * E, 3 * E), lambda n: (0, 0)),  # Wqkv block-diag (resident)
                pl.BlockSpec((E, E), lambda n: (0, 0)),          # Wfc^T (resident)
                pl.BlockSpec((1, E), lambda n: (0, 0)),          # bias (resident)
            ],
            out_specs=pl.BlockSpec((1, L, E), lambda n: (n, 0, 0)),
        ),
        compiler_params=pltpu.CompilerParams(
            dimension_semantics=("parallel",)),
    )(qkv, wqkv, wfc_t, b2)
    return out


def self_attention_reference(values, keys, query, params, embed_size, heads):
    """Pure-JAX fp32 replica of the PyTorch forward, for verification."""
    N, L, E = query.shape
    d = E // heads
    v = values.reshape(N, L, heads, d) @ params["wv"].T
    k = keys.reshape(N, L, heads, d) @ params["wk"].T
    q = query.reshape(N, L, heads, d) @ params["wq"].T
    e = jnp.einsum("nqhd,nkhd->nhqk", q, k)
    attn = jax.nn.softmax(e / (embed_size ** 0.5), axis=3)
    out = jnp.einsum("nhql,nlhd->nqhd", attn, v).reshape(N, L, heads * d)
    return out @ params["wfc"].T + params["b"]


if __name__ == "__main__":
    N, L, embed_size, heads = 2, 8, 32, 4
    d = embed_size // heads

    key = jax.random.PRNGKey(0)
    ks = jax.random.split(key, 8)

    values = jax.random.normal(ks[0], (N, L, embed_size), dtype=jnp.float32)
    keys_in = jax.random.normal(ks[1], (N, L, embed_size), dtype=jnp.float32)
    query = jax.random.normal(ks[2], (N, L, embed_size), dtype=jnp.float32)

    # Deterministic parameter init (shapes follow nn.Linear: weight = (out, in)).
    params = {
        "wq": jax.random.normal(ks[3], (d, d), dtype=jnp.float32) * 0.1,
        "wk": jax.random.normal(ks[4], (d, d), dtype=jnp.float32) * 0.1,
        "wv": jax.random.normal(ks[5], (d, d), dtype=jnp.float32) * 0.1,
        "wfc": jax.random.normal(ks[6], (embed_size, heads * d), dtype=jnp.float32) * 0.1,
        "b": jax.random.normal(ks[7], (embed_size,), dtype=jnp.float32) * 0.1,
    }

    out = self_attention_pallas(values, keys_in, query, params, embed_size, heads)
    out = jax.block_until_ready(out)

    ref = self_attention_reference(values, keys_in, query, params, embed_size, heads)
    assert out.shape == (N, L, embed_size)
    # Tolerance loosened vs. the fp32 reference: bf16 MXU inputs + approx reciprocal.
    assert jnp.allclose(out, ref, atol=2e-2, rtol=2e-2), "mismatch vs reference"

    print("KERNEL_OK")
</pallas_src>

<mosaic_0001>
module attributes {stable_mosaic.version = 11 : i64} {
  func.func @self_attention_kernel(%arg0: i32, %arg1: memref<1x8x96xbf16, #tpu.memory_space<vmem>>, %arg2: memref<96x96xbf16, #tpu.memory_space<vmem>>, %arg3: memref<32x32xbf16, #tpu.memory_space<vmem>>, %arg4: memref<1x32xf32, #tpu.memory_space<vmem>>, %arg5: memref<1x8x32xf32, #tpu.memory_space<vmem>>) attributes {dimension_semantics = [#tpu.dimension_semantics<parallel>], iteration_bounds = array<i64: 2>, scalar_prefetch = 0 : i64, scratch_operands = 0 : i64, tpu.core_type = #tpu.core_type<tc>, window_params = [{transform_indices = @transform_0, window_bounds = array<i64: 1, 8, 96>}, {pipeline_mode = #tpu.pipeline_mode<synchronous>, transform_indices = @transform_1, window_bounds = array<i64: 96, 96>}, {pipeline_mode = #tpu.pipeline_mode<synchronous>, transform_indices = @transform_2, window_bounds = array<i64: 32, 32>}, {pipeline_mode = #tpu.pipeline_mode<synchronous>, transform_indices = @transform_3, window_bounds = array<i64: 1, 32>}, {transform_indices = @transform_4, window_bounds = array<i64: 1, 8, 32>}]} {
    %c0 = arith.constant 0 : index
    %c0_0 = arith.constant 0 : index
    %c0_1 = arith.constant 0 : index
    %0 = vector.load %arg1[%c0, %c0_0, %c0_1] : memref<1x8x96xbf16, #tpu.memory_space<vmem>>, vector<1x8x96xbf16>
    %1 = vector.shape_cast %0 : vector<1x8x96xbf16> to vector<8x96xbf16>
    %c0_2 = arith.constant 0 : index
    %c0_3 = arith.constant 0 : index
    %2 = vector.load %arg2[%c0_2, %c0_3] : memref<96x96xbf16, #tpu.memory_space<vmem>>, vector<96x96xbf16>
    %cst = arith.constant dense<0.000000e+00> : vector<8x96xf32>
    %3 = tpu.matmul %1, %2, %cst {dimension_numbers = #tpu.dot_dimension_numbers<[1], [0], [0], [1], [0, 0, 1, 1], [], []>} : vector<8x96xbf16>, vector<96x96xbf16>, vector<8x96xf32> -> vector<8x96xf32>
    %4 = arith.truncf %3 : vector<8x96xf32> to vector<8x96xbf16>
    %5 = vector.extract_strided_slice %4 {offsets = [0, 0], sizes = [8, 8], strides = [1, 1]} : vector<8x96xbf16> to vector<8x8xbf16>
    %6 = vector.extract_strided_slice %4 {offsets = [0, 32], sizes = [8, 8], strides = [1, 1]} : vector<8x96xbf16> to vector<8x8xbf16>
    %7 = vector.extract_strided_slice %4 {offsets = [0, 64], sizes = [8, 8], strides = [1, 1]} : vector<8x96xbf16> to vector<8x8xbf16>
    %cst_4 = arith.constant dense<0.000000e+00> : vector<8x8xf32>
    %8 = tpu.matmul %5, %6, %cst_4 {dimension_numbers = #tpu.dot_dimension_numbers<[1], [1], [0], [0], [0, 0, 1, 0], [], []>} : vector<8x8xbf16>, vector<8x8xbf16>, vector<8x8xf32> -> vector<8x8xf32>
    %cst_5 = arith.constant 0.176776692 : f32
    %9 = vector.broadcast %cst_5 : f32 to vector<8x8xf32>
    %10 = arith.mulf %8, %9 : vector<8x8xf32>
    %cst_6 = arith.constant dense<0xFF800000> : vector<8xf32>
    %11 = vector.multi_reduction <maximumf>, %10, %cst_6 [1] : vector<8x8xf32> to vector<8xf32>
    %12 = vector.shape_cast %11 : vector<8xf32> to vector<8x1xf32>
    %13 = vector.broadcast %12 : vector<8x1xf32> to vector<8x8xf32>
    %14 = arith.subf %10, %13 : vector<8x8xf32>
    %15 = math.exp %14 : vector<8x8xf32>
    %cst_7 = arith.constant dense<0.000000e+00> : vector<8xf32>
    %16 = vector.multi_reduction <add>, %15, %cst_7 [1] : vector<8x8xf32> to vector<8xf32>
    %17 = vector.shape_cast %16 : vector<8xf32> to vector<8x1xf32>
    %18 = tpu.reciprocal %17 {approx = true} : vector<8x1xf32> -> vector<8x1xf32>
    %19 = vector.broadcast %18 : vector<8x1xf32> to vector<8x8xf32>
    %20 = arith.mulf %15, %19 : vector<8x8xf32>
    %21 = arith.truncf %20 : vector<8x8xf32> to vector<8x8xbf16>
    %cst_8 = arith.constant dense<0.000000e+00> : vector<8x8xf32>
    %22 = tpu.matmul %21, %7, %cst_8 {dimension_numbers = #tpu.dot_dimension_numbers<[1], [0], [0], [1], [0, 0, 1, 1], [], []>} : vector<8x8xbf16>, vector<8x8xbf16>, vector<8x8xf32> -> vector<8x8xf32>
    %23 = vector.extract_strided_slice %4 {offsets = [0, 8], sizes = [8, 8], strides = [1, 1]} : vector<8x96xbf16> to vector<8x8xbf16>
    %24 = vector.extract_strided_slice %4 {offsets = [0, 40], sizes = [8, 8], strides = [1, 1]} : vector<8x96xbf16> to vector<8x8xbf16>
    %25 = vector.extract_strided_slice %4 {offsets = [0, 72], sizes = [8, 8], strides = [1, 1]} : vector<8x96xbf16> to vector<8x8xbf16>
    %cst_9 = arith.constant dense<0.000000e+00> : vector<8x8xf32>
    %26 = tpu.matmul %23, %24, %cst_9 {dimension_numbers = #tpu.dot_dimension_numbers<[1], [1], [0], [0], [0, 0, 1, 0], [], []>} : vector<8x8xbf16>, vector<8x8xbf16>, vector<8x8xf32> -> vector<8x8xf32>
    %cst_10 = arith.constant 0.176776692 : f32
    %27 = vector.broadcast %cst_10 : f32 to vector<8x8xf32>
    %28 = arith.mulf %26, %27 : vector<8x8xf32>
    %cst_11 = arith.constant dense<0xFF800000> : vector<8xf32>
    %29 = vector.multi_reduction <maximumf>, %28, %cst_11 [1] : vector<8x8xf32> to vector<8xf32>
    %30 = vector.shape_cast %29 : vector<8xf32> to vector<8x1xf32>
    %31 = vector.broadcast %30 : vector<8x1xf32> to vector<8x8xf32>
    %32 = arith.subf %28, %31 : vector<8x8xf32>
    %33 = math.exp %32 : vector<8x8xf32>
    %cst_12 = arith.constant dense<0.000000e+00> : vector<8xf32>
    %34 = vector.multi_reduction <add>, %33, %cst_12 [1] : vector<8x8xf32> to vector<8xf32>
    %35 = vector.shape_cast %34 : vector<8xf32> to vector<8x1xf32>
    %36 = tpu.reciprocal %35 {approx = true} : vector<8x1xf32> -> vector<8x1xf32>
    %37 = vector.broadcast %36 : vector<8x1xf32> to vector<8x8xf32>
    %38 = arith.mulf %33, %37 : vector<8x8xf32>
    %39 = arith.truncf %38 : vector<8x8xf32> to vector<8x8xbf16>
    %cst_13 = arith.constant dense<0.000000e+00> : vector<8x8xf32>
    %40 = tpu.matmul %39, %25, %cst_13 {dimension_numbers = #tpu.dot_dimension_numbers<[1], [0], [0], [1], [0, 0, 1, 1], [], []>} : vector<8x8xbf16>, vector<8x8xbf16>, vector<8x8xf32> -> vector<8x8xf32>
    %41 = vector.extract_strided_slice %4 {offsets = [0, 16], sizes = [8, 8], strides = [1, 1]} : vector<8x96xbf16> to vector<8x8xbf16>
    %42 = vector.extract_strided_slice %4 {offsets = [0, 48], sizes = [8, 8], strides = [1, 1]} : vector<8x96xbf16> to vector<8x8xbf16>
    %43 = vector.extract_strided_slice %4 {offsets = [0, 80], sizes = [8, 8], strides = [1, 1]} : vector<8x96xbf16> to vector<8x8xbf16>
    %cst_14 = arith.constant dense<0.000000e+00> : vector<8x8xf32>
    %44 = tpu.matmul %41, %42, %cst_14 {dimension_numbers = #tpu.dot_dimension_numbers<[1], [1], [0], [0], [0, 0, 1, 0], [], []>} : vector<8x8xbf16>, vector<8x8xbf16>, vector<8x8xf32> -> vector<8x8xf32>
    %cst_15 = arith.constant 0.176776692 : f32
    %45 = vector.broadcast %cst_15 : f32 to vector<8x8xf32>
    %46 = arith.mulf %44, %45 : vector<8x8xf32>
    %cst_16 = arith.constant dense<0xFF800000> : vector<8xf32>
    %47 = vector.multi_reduction <maximumf>, %46, %cst_16 [1] : vector<8x8xf32> to vector<8xf32>
    %48 = vector.shape_cast %47 : vector<8xf32> to vector<8x1xf32>
    %49 = vector.broadcast %48 : vector<8x1xf32> to vector<8x8xf32>
    %50 = arith.subf %46, %49 : vector<8x8xf32>
    %51 = math.exp %50 : vector<8x8xf32>
    %cst_17 = arith.constant dense<0.000000e+00> : vector<8xf32>
    %52 = vector.multi_reduction <add>, %51, %cst_17 [1] : vector<8x8xf32> to vector<8xf32>
    %53 = vector.shape_cast %52 : vector<8xf32> to vector<8x1xf32>
    %54 = tpu.reciprocal %53 {approx = true} : vector<8x1xf32> -> vector<8x1xf32>
    %55 = vector.broadcast %54 : vector<8x1xf32> to vector<8x8xf32>
    %56 = arith.mulf %51, %55 : vector<8x8xf32>
    %57 = arith.truncf %56 : vector<8x8xf32> to vector<8x8xbf16>
    %cst_18 = arith.constant dense<0.000000e+00> : vector<8x8xf32>
    %58 = tpu.matmul %57, %43, %cst_18 {dimension_numbers = #tpu.dot_dimension_numbers<[1], [0], [0], [1], [0, 0, 1, 1], [], []>} : vector<8x8xbf16>, vector<8x8xbf16>, vector<8x8xf32> -> vector<8x8xf32>
    %59 = vector.extract_strided_slice %4 {offsets = [0, 24], sizes = [8, 8], strides = [1, 1]} : vector<8x96xbf16> to vector<8x8xbf16>
    %60 = vector.extract_strided_slice %4 {offsets = [0, 56], sizes = [8, 8], strides = [1, 1]} : vector<8x96xbf16> to vector<8x8xbf16>
    %61 = vector.extract_strided_slice %4 {offsets = [0, 88], sizes = [8, 8], strides = [1, 1]} : vector<8x96xbf16> to vector<8x8xbf16>
    %cst_19 = arith.constant dense<0.000000e+00> : vector<8x8xf32>
    %62 = tpu.matmul %59, %60, %cst_19 {dimension_numbers = #tpu.dot_dimension_numbers<[1], [1], [0], [0], [0, 0, 1, 0], [], []>} : vector<8x8xbf16>, vector<8x8xbf16>, vector<8x8xf32> -> vector<8x8xf32>
    %cst_20 = arith.constant 0.176776692 : f32
    %63 = vector.broadcast %cst_20 : f32 to vector<8x8xf32>
    %64 = arith.mulf %62, %63 : vector<8x8xf32>
    %cst_21 = arith.constant dense<0xFF800000> : vector<8xf32>
    %65 = vector.multi_reduction <maximumf>, %64, %cst_21 [1] : vector<8x8xf32> to vector<8xf32>
    %66 = vector.shape_cast %65 : vector<8xf32> to vector<8x1xf32>
    %67 = vector.broadcast %66 : vector<8x1xf32> to vector<8x8xf32>
    %68 = arith.subf %64, %67 : vector<8x8xf32>
    %69 = math.exp %68 : vector<8x8xf32>
    %cst_22 = arith.constant dense<0.000000e+00> : vector<8xf32>
    %70 = vector.multi_reduction <add>, %69, %cst_22 [1] : vector<8x8xf32> to vector<8xf32>
    %71 = vector.shape_cast %70 : vector<8xf32> to vector<8x1xf32>
    %72 = tpu.reciprocal %71 {approx = true} : vector<8x1xf32> -> vector<8x1xf32>
    %73 = vector.broadcast %72 : vector<8x1xf32> to vector<8x8xf32>
    %74 = arith.mulf %69, %73 : vector<8x8xf32>
    %75 = arith.truncf %74 : vector<8x8xf32> to vector<8x8xbf16>
    %cst_23 = arith.constant dense<0.000000e+00> : vector<8x8xf32>
    %76 = tpu.matmul %75, %61, %cst_23 {dimension_numbers = #tpu.dot_dimension_numbers<[1], [0], [0], [1], [0, 0, 1, 1], [], []>} : vector<8x8xbf16>, vector<8x8xbf16>, vector<8x8xf32> -> vector<8x8xf32>
    %77 = tpu.concatenate %22, %40, %58, %76 in 1 : vector<8x8xf32>, vector<8x8xf32>, vector<8x8xf32>, vector<8x8xf32> -> vector<8x32xf32>
    %78 = arith.truncf %77 : vector<8x32xf32> to vector<8x32xbf16>
    %c0_24 = arith.constant 0 : index
    %c0_25 = arith.constant 0 : index
    %79 = vector.load %arg3[%c0_24, %c0_25] : memref<32x32xbf16, #tpu.memory_space<vmem>>, vector<32x32xbf16>
    %cst_26 = arith.constant dense<0.000000e+00> : vector<8x32xf32>
    %80 = tpu.matmul %78, %79, %cst_26 {dimension_numbers = #tpu.dot_dimension_numbers<[1], [0], [0], [1], [0, 0, 1, 1], [], []>} : vector<8x32xbf16>, vector<32x32xbf16>, vector<8x32xf32> -> vector<8x32xf32>
    %c0_27 = arith.constant 0 : index
    %c0_28 = arith.constant 0 : index
    %81 = vector.load %arg4[%c0_27, %c0_28] : memref<1x32xf32, #tpu.memory_space<vmem>>, vector<1x32xf32>
    %82 = vector.broadcast %81 : vector<1x32xf32> to vector<8x32xf32>
    %83 = arith.addf %80, %82 : vector<8x32xf32>
    %c0_29 = arith.constant 0 : index
    %c0_30 = arith.constant 0 : index
    %c0_31 = arith.constant 0 : index
    %84 = vector.load %arg5[%c0_29, %c0_30, %c0_31] : memref<1x8x32xf32, #tpu.memory_space<vmem>>, vector<1x8x32xf32>
    %85 = vector.shape_cast %84 : vector<1x8x32xf32> to vector<8x32xf32>
    %86 = vector.shape_cast %83 : vector<8x32xf32> to vector<1x8x32xf32>
    tpu.vector_store %arg5[%c0_29, %c0_30, %c0_31], %86 {strides = array<i32>} : memref<1x8x32xf32, #tpu.memory_space<vmem>>, vector<1x8x32xf32>,
    return
  }
  func.func @transform_0(%arg0: i32) -> (i32, i32, i32) {
    %c0_i32 = arith.constant 0 : i32
    %c0_i32_0 = arith.constant 0 : i32
    %c0_i32_1 = arith.constant 0 : i32
    return %arg0, %c0_i32, %c0_i32_0 : i32, i32, i32
  }
  func.func @transform_1(%arg0: i32) -> (i32, i32) {
    %c0_i32 = arith.constant 0 : i32
    %c0_i32_0 = arith.constant 0 : i32
    %c0_i32_1 = arith.constant 0 : i32
    return %c0_i32, %c0_i32_0 : i32, i32
  }
  func.func @transform_2(%arg0: i32) -> (i32, i32) {
    %c0_i32 = arith.constant 0 : i32
    %c0_i32_0 = arith.constant 0 : i32
    %c0_i32_1 = arith.constant 0 : i32
    return %c0_i32, %c0_i32_0 : i32, i32
  }
  func.func @transform_3(%arg0: i32) -> (i32, i32) {
    %c0_i32 = arith.constant 0 : i32
    %c0_i32_0 = arith.constant 0 : i32
    %c0_i32_1 = arith.constant 0 : i32
    return %c0_i32, %c0_i32_0 : i32, i32
  }
  func.func @transform_4(%arg0: i32) -> (i32, i32, i32) {
    %c0_i32 = arith.constant 0 : i32
    %c0_i32_0 = arith.constant 0 : i32
    %c0_i32_1 = arith.constant 0 : i32
    return %arg0, %c0_i32, %c0_i32_0 : i32, i32, i32
  }
}

</mosaic_0001>

<bundles_post_ra>
// kernel: tpu_custom_call.1
= control target key start
LH: loop header
LB: loop body
LE: loop exit
PB: predicated region body
PF: predicated region fallthrough
CT: control target
= control target key end

     0   :  { %9 = vsyncpa [#allocation3], 0  ;;  %s1729_s0 = inlined_call_operand.hbm [shape: bf16[2,8,96], index: 0, kind: input, shape index: {}]   ;;  %s1730_s1 = inlined_call_operand.hbm [shape: bf16[96,96], index: 1, kind: input, shape index: {}]   ;;  %s1731_s2 = inlined_call_operand.hbm [shape: bf16[32,32], index: 2, kind: input, shape index: {}]   ;;  %s1732_s3 = inlined_call_operand.vmem [shape: f32[1,32], index: 3, kind: input, shape index: {}]   ;;  %s1733_s4 = inlined_call_operand.hbm [shape: f32[2,8,32], index: 4, kind: output, shape index: {}]  }
   0x1   :  { %11 = vsyncpa [#allocation3 + $0x1], 0 }
   0x2   :  { %12 = vsyncpa [#allocation6], 0 }
   0x3   :  { %13 = vsyncpa [#allocation4], 0 }
   0x4   :  { %15 = vsyncpa [#allocation4 + $0x1], 0  ;;  %s1418_s15 = smov 0   ;;  %s1420_s16 = smov 0  }
   0x5   :  { %s1422_s17 = smov 0   ;;  %s1424_s18 = smov 0  }
   0x6 LB: > { %s1439_s19 = sadd.s32 4294967295, %s1369_s18   ;;  %s971_s20 = sadd.s32 4294967294, %s1369_s18   ;;  %s1369_s18 = sphi %s1424_s18, %s1753_s18   ;;  %s1365_s17 = sphi %s1422_s17, %s1752_s17   ;;  %s1361_s16 = sphi %s1420_s16, %s1751_s16   ;;  %s1357_s15 = sphi %s1418_s15, %s1750_s15  }
   0x7   : > { %p41_p0 = scmp.ne.s32.totalorder %s1361_s16, %s1357_s15  ;;  %p1734_p1 = scmp.eq.s32.totalorder %s1439_s19, 0 }
   0x8   : > { %p134_p3 = scmp.eq.s32.totalorder %s971_s20, 1  ;;  %p972_p5 = scmp.ge.s32.totalorder %s1369_s18, 1 }
   0x9   : > { %p1448_p4 = por %p1734_p1, %p41_p0  ;;  %p141_p7 = scmp.lt.s32.totalorder %s1369_s18, 3 }
   0xa   : > { %p1453_p6 = por %p134_p3, %p41_p0  ;;  %s1371_s24 = smov [#allocation5]  }
   0xb   : > { %s1737_s21 = scalar_select %p1448_p4, 1, 0 }
   0xc   : > { %s1738_s22 = scalar_select %p1453_p6, 1, 0 }
   0xd   : > { %p1458_p8 = pnand %p972_p5, %p141_p7  ;;  %s153_s25 = sshll.u32 %s1371_s24, 4  ;;  %s1462_s25 = int_to_ptr.vmem [resolvable:$true] %s153_s25 }
   0xe   : > { %s1372_s27 = smov [#allocation7]   ;;  %s1213_s5 = scalar_lea.hbm %s1730_s1, 768 }
   0xf   : > { %p1116_p9 = pneg %p1458_p8  ;;  %s166_s28 = sshll.u32 %s1372_s27, 4  ;;  %s1473_s28 = int_to_ptr.vmem [resolvable:$true] %s166_s28 }
  0x10   : > { %p1214_p12 = scmp.ne.s32.totalorder %s1730_s1, %s1213_s5  ;;  %p1220_p5 = scmp.lt.u32.totalorder %s1213_s5, %s1730_s1 }
  0x11   : > { %p1469_p11 = pnand %p1116_p9, %p1734_p1 }
  0x13   : > { %p1215_p13 = pneg %p1469_p11 }
  0x15   : > { %p1216_p0 = pnand %p1215_p13, %p1214_p12 }
  0x17   : > { %p1217_p3 = pneg %p1216_p0 }
  0x19   : > { %p1222_p7 = pnand %p1220_p5, %p1217_p3 }
  0x1b   : > { %1225 = shalt.err (!%p1222_p7)
}
  0x1c   : > { %s1226_s10 = scalar_lea.vmem %s1462_s25, 768  ;;  %p1234_p2 = scmp.lt.s32.totalorder %s1462_s25, %s1462_s25 }
  0x1d   : > { %p1227_p9 = scmp.ne.s32.totalorder %s1462_s25, %s1226_s10  ;;  %p1235_p12 = scmp.lt.s32.totalorder %s1226_s10, %s1226_s10 }
  0x1f   : > { %p1229_p10 = pnand %p1227_p9, %p1215_p13  ;;  %p1236_p0 = por %p1235_p12, %p1234_p2 }
  0x21   : > { %p1230_p1 = pneg %p1229_p10 }
  0x23   : > { %p1237_p6 = pnand %p1236_p0, %p1230_p1 }
  0x25   : > { %1240 = shalt.err (!%p1237_p6)
}
  0x26   : > { %s1373_s11 = smov 64   ;;  %s1374_s12 = smov 4  }
  0x27   : > { %1119 = dma.hbm_to_vmem [thread:$0]  (!%p1469_p11), %s1730_s1, 768, %s1462_s25, [#allocation6], %s1373_s11, %s1373_s11, %s1374_s12  }
  0x28   : > { %s1241_s27 = scalar_lea.hbm %s1731_s2, 256 }
  0x29   : > { %p1242_p2 = scmp.ne.s32.totalorder %s1731_s2, %s1241_s27  ;;  %p1248_p10 = scmp.lt.u32.totalorder %s1241_s27, %s1731_s2 }
  0x2b   : > { %p1244_p1 = pnand %p1242_p2, %p1215_p13 }
  0x2d   : > { %p1245_p6 = pneg %p1244_p1 }
  0x2f   : > { %p1250_p3 = pnand %p1248_p10, %p1245_p6 }
  0x31   : > { %1253 = shalt.err (!%p1250_p3)
}
  0x32   : > { %s1254_s25 = scalar_lea.vmem %s1473_s28, 256  ;;  %p1262_p12 = scmp.lt.s32.totalorder %s1473_s28, %s1473_s28 }
  0x33   : > { %p1255_p5 = scmp.ne.s32.totalorder %s1473_s28, %s1254_s25  ;;  %p1263_p0 = scmp.lt.s32.totalorder %s1254_s25, %s1254_s25 }
  0x35   : > { %p1257_p7 = pnand %p1255_p5, %p1215_p13  ;;  %p1264_p2 = por %p1263_p0, %p1262_p12 }
  0x37   : > { %p1258_p9 = pneg %p1257_p7 }
  0x39   : > { %p1265_p1 = pnand %p1264_p2, %p1258_p9 }
  0x3b   : > { %1268 = shalt.err (!%p1265_p1)
}
  0x3c   : > { %1122 = dma.hbm_to_vmem [thread:$0]  (!%p1469_p11), %s1731_s2, 256, %s1473_s28, [#allocation6], %s1373_s11, %s1373_s11, %s1374_s12  }
  0x3d   : > { %s1528_s9 = sadd.s32 1, %s1369_s18   ;;  %s28_s26 = sadd.s32 1, %s1365_s17 }
  0x3e   : > { %s25_s10 = ssub.s32 %s1369_s18, %s1528_s9  ;;  %p35_p13 = scmp.ne.s32.totalorder %s1365_s17, %s1361_s16 }
  0x3f   : > { %p26_p6 = scmp.eq.s32.totalorder %s25_s10, 0  ;;  %p36_p10 = scmp.eq.s32.totalorder %s1369_s18, 0 }
  0x40   : > { %p1741_p3 = scmp.eq.s32.totalorder %s1439_s19, 1  ;;  %p1133_p7 = scmp.lt.s32.totalorder %s1369_s18, 2 }
  0x41   : > { %s1544_s14 = scalar_select %p26_p6, %s1365_s17, %s28_s26  }
  0x42   : > { %p1538_p5 = por %p1741_p3, %p35_p13  ;;  %p37_p9 = por %p36_p10, %p35_p13 }
  0x43   : > { %s183_s20 = sand.u32 1, %s1365_s17   ;;  %s977_s28 = sshll.u32 %s1369_s18, 6 }
  0x44   : > { %s1742_s13 = scalar_select %p1538_p5, 1, 0 }
  0x45   : > { %s976_s24 = sshll.u32 %s183_s20, 2  ;;  %s1551_s27 = scalar_lea.hbm %s1729_s0, %s977_s28 }
  0x46   : > { %s187_s29 = scalar_lea.vmem [#allocation2], %s976_s24  ;;  %p1555_p11 = pnand %p1133_p7, %p37_p9 }
  0x47   : > { %s194_s30 = sshll.u32 %s187_s29, 4  ;;  %s184_s6 = scalar_lea.sflag [#allocation3], %s183_s20  ;;  %s1553_s30 = int_to_ptr.vmem [resolvable:$true] %s194_s30 }
  0x48   : > { %s1269_s25 = scalar_lea.hbm %s1551_s27, 64  ;;  %p1271_p0 = pneg %p1555_p11 }
  0x49   : > { %p1270_p12 = scmp.ne.s32.totalorder %s1551_s27, %s1269_s25  ;;  %s1274_s26 = scalar_lea.hbm %s1729_s0, 128 }
  0x4a   : > { %p1275_p13 = scmp.lt.u32.totalorder %s1551_s27, %s1729_s0  ;;  %p1276_p6 = scmp.lt.u32.totalorder %s1274_s26, %s1269_s25 }
  0x4b   : > { %p1272_p2 = pnand %p1271_p0, %p1270_p12  ;;  %p1278_p3 = scmp.lt.u32.totalorder %s1269_s25, %s1551_s27 }
  0x4c   : > { %p1277_p10 = por %p1276_p6, %p1275_p13 }
  0x4d   : > { %p1273_p1 = pneg %p1272_p2 }
  0x4e   : > { %p1279_p7 = por %p1278_p3, %p1277_p10 }
  0x50   : > { %p1280_p9 = pnand %p1279_p7, %p1273_p1 }
  0x52   : > { %1283 = shalt.err (!%p1280_p9)
}
  0x53   : > { %s1284_s20 = scalar_lea.vmem %s1553_s30, 64  ;;  %s1375_s28 = smov [#allocation2]  }
  0x54   : > { %p1285_p12 = scmp.ne.s32.totalorder %s1553_s30, %s1284_s20  ;;  %s1289_s11 = sshll.u32 %s1375_s28, 4  ;;  %s1290_s11 = int_to_ptr.vmem [resolvable:$false] %s1289_s11 }
  0x55   : > { %s1291_s12 = scalar_lea.vmem %s1290_s11, 128  ;;  %p1292_p4 = scmp.lt.s32.totalorder %s1553_s30, %s1290_s11 }
  0x56   : > { %p1287_p2 = pnand %p1285_p12, %p1271_p0  ;;  %p1293_p13 = scmp.lt.s32.totalorder %s1291_s12, %s1284_s20 }
  0x58   : > { %p1288_p5 = pneg %p1287_p2  ;;  %p1294_p6 = por %p1293_p13, %p1292_p4 }
  0x5a   : > { %p1295_p10 = pnand %p1294_p6, %p1288_p5 }
  0x5c   : > { %1298 = shalt.err (!%p1295_p10)
}
  0x5d   : > { %1126 = dma.hbm_to_vmem [thread:$0]  (!%p1555_p11), %s1551_s27, 64, %s1553_s30, %s184_s6  }
  0x5e   : > { %203 = sbr.rel (%p1458_p8) target bundleno = 2155 (0x86b), region = 36  ;;  %s1587_s29 = sand.u32 (!%p1458_p8), 1, %s1361_s16  }
  0x5f   : > { %s979_s25 = sshll.u32 (!%p1458_p8), %s1587_s29, 2  ;;  %s206_s7 = scalar_lea.sflag (!%p1458_p8), [#allocation3], %s1587_s29 }
  0x60   : > { %s209_s8 = scalar_lea.vmem (!%p1458_p8), [#allocation2], %s979_s25  ;;  %p1744_p4 = scmp.ne.s32.totalorder (!%p1458_p8), %s1737_s21, 0 }
  0x65   : > { %1344 = dma.done.wait (%p1744_p4), %s206_s7, 64  }
  0x66   : > { %1346 = vsyncadd (%p1744_p4), %s206_s7, 4294967232  ;;  %p1745_p5 = scmp.eq.s32.totalorder %s1439_s19, 0 }
  0x68   : > { %1348 = dma.done.wait (%p1745_p5), [#allocation6], 1024   ;;  %p1746_p11 = pmov %p1745_p5 }
  0x69   : > { %v1376_v0 = vmov 0.0   ;;  %vm1377_vm0 = vmmov 0   ;;  %v1189_v1 = vld [vmem:[#allocation5] sm:$0xff]   ;;  %v1190_v2 = vld [vmem:[#allocation5 + $0x8] sm:$0xff]   ;;  %v1191_v3 = vld [vmem:[#allocation5 + $0x10] sm:$0xff]   ;;  %vm292_vm1 = vcmask 785408  }
  0x6a   : > { %1350 = vsyncadd (%p1746_p11), [#allocation6], 4294966272  ;;  %1032 = vmatprep.subr.bf16.mxu0 %v1376_v0  ;;  %1044 = vmatprep.mubr.msk.bf16.mxu0 %vm1377_vm0, %v1376_v0  ;;  %v1192_v4 = vld [vmem:[#allocation5 + $0x18] sm:$0xff]   ;;  %v1193_v5 = vld [vmem:[#allocation5 + $0x20] sm:$0xff]   ;;  %s1378_s21 = smov 64   ;;  %s1379_s23 = smov 96  }
  0x6b   : > { %1048 = vmatprep.subr.bf16.mxu1 %v1376_v0  ;;  %1050 = vmatprep.mubr.msk.bf16.mxu1 %vm1377_vm0, %v1376_v0  ;;  %v1194_v6 = vld [vmem:[#allocation5 + $0x28] sm:$0xff]   ;;  %v243_v7 = vld [vmem:[%s209_s8] sm:$0xf]  ;;  %s1380_s27 = smov 88   ;;  %vm340_vm2 = vcmask 64512   ;;  %vm405_vm3 = vcmask 1043456  }
  0x6c   : > { %1033 = vmatpush3.bf16.msra.mxu0 %v1189_v1  ;;  %s1381_s30 = smov 72   ;;  %s1382_s5 = smov 120   ;;  %vm795_vm4 = vcmask 130048   ;;  %vm797_vm5 = vcmask 195584   ;;  %vm823_vm6 = vcmask 261120  }
  0x6d   : > { %1034 = vmatprep.subr.bf16.mxu0 %v1376_v0  ;;  %s1383_s6 = smov 80   ;;  %s1384_s26 = smov 112  }
  0x6e   : > { %s1385_s10 = smov 104   ;;  %s1386_s24 = smov 56  }
  0x6f   : > { %s1387_s20 = smov 48   ;;  %s1388_s28 = smov 40  }
  0x70   : > { %1035 = vmatpush3.bf16.msra.mxu0 %v1190_v2  ;;  %s1389_s11 = smov 8   ;;  %s1390_s12 = smov 16  }
  0x71   : > { %1036 = vmatprep.subr.bf16.mxu0 %v1376_v0  ;;  %s1391_s25 = smov 24   ;;  %s982_s7 = sshll.u32 %s1587_s29, 3 }
  0x72   : > { %p1747_p0 = scmp.ne.s32.totalorder %s1742_s13, 0 }
  0x74   : > { %1037 = vmatpush3.bf16.msra.mxu0 %v1191_v3 }
  0x75   : > { %1038 = vmatprep.subr.bf16.mxu0 %v1376_v0 }
  0x78   : > { %1039 = vmatpush3.bf16.msra.mxu0 %v1192_v4 }
  0x79   : > { %1040 = vmatprep.subr.bf16.mxu0 %v1376_v0 }
  0x7c   : > { %1041 = vmatpush3.bf16.msra.mxu0 %v1193_v5 }
  0x7d   : > { %1042 = vmatprep.subr.bf16.mxu0 %v1376_v0 }
  0x80   : > { %1043 = vmatpush3.bf16.msra.mxu0 %v1194_v6 }
  0x81   : > { %1066 = vmatprep.subr.bf16.mxu0 %v1376_v0 }
  0x83   : > { %1045 = vmatmul.mubr.msk.bf16.vlgmr.msra.gmra.mrb[0].mxu0 %vm292_vm1, %v243_v7 }
  0x84   : > { %1068 = vmatprep.mubr.msk.bf16.mxu0 %vm1377_vm0, %v1376_v0 }
 0x156   : > { %v330_v8 = vpop.f32.mrb[0].mxu0 }
 0x157   : > { %v1613_v9 = vpack.c.bf16 %v330_v8, %v330_v8  ;;  %v1046_v10 = vpop.f32.mrb[1].mxu0 }
 0x158   : > { %v333_v11 = vpop.f32.mrb[2].mxu0 }
 0x159   : > { %400 = vrot.lane.b32.xlu1 %v1613_v9, %s1378_s21  ;;  %338 = vrot.lane.b32.xlu0 %v1613_v9, %s1379_s23  ;;  %v1047_v12 = vpop.f32.mrb[3].mxu0  ;;  %s1003_s23 = sshll.u32 %s1439_s19, 7 }
 0x15d   : > { %451 = vrot.lane.b32.xlu1 %v1613_v9, %s1380_s27  ;;  %s241_s27 = scalar_lea.vmem [#allocation8], %s982_s7 }
 0x1cb   : > { %v339_v13 = vpop.permute.xlu0 %338  ;;  %v401_v15 = vpop.permute.xlu1 %400 }
 0x1cc   : > { %v345_v14 = vsel %vm340_vm2, %v339_v13, 0  ;;  %v407_v16 = vsel %vm405_vm3, %v401_v15, 0 }
 0x1cd   : > { %1049 = vmatpush3.bf16.xpose.msra.mxu1 %v345_v14 }
 0x1ce   : > { %1054 = vmatprep.subr.bf16.mxu1 %v1376_v0 }
 0x1cf   : > { %v452_v28 = vpop.permute.xlu1 %451 }
 0x1d0   : > { %v457_v34 = vsel %vm340_vm2, %v452_v28, 0 }
 0x1d4   : > { %1051 = vmatmul.mubr.msk.bf16.vlgmr.msra.gmra.mrb[0].mxu1 %vm340_vm2, %v1613_v9 }
 0x1d5   : > { %1055 = vmatpush3.bf16.msra.mxu1 %v407_v16  ;;  %1056 = vmatprep.mubr.msk.bf16.mxu1 %vm1377_vm0, %v1376_v0 }
 0x1d6   : > { %1060 = vmatprep.subr.bf16.mxu1 %v1376_v0 }
 0x2a7   : > { %v381_v17 = vpop.f32.mrb[0].mxu1 }
 0x2a8   : > { %v387_v18 = vmul.f32 0.17677669, %v381_v17  ;;  %v1052_v19 = vpop.f32.mrb[1].mxu1 }
 0x2a9   : > { %v384_v20 = vpop.f32.mrb[2].mxu1 }
 0x2aa   : > { %v1053_v21 = vpop.f32.mrb[3].mxu1  ;;  %v388_v22 = vsel %vm340_vm2, %v387_v18, -inf }
 0x2ab   : > { %389 = vmax.xlane.f32.xlu0 %v388_v22 }
 0x2c1   : > { %673 = vrot.lane.b32.xlu0 %v1613_v9, %s1381_s30  ;;  %s882_s30 = sshll.u32 %s241_s27, 4  ;;  %s1687_s30 = int_to_ptr.vmem [resolvable:$true] %s882_s30 }
 0x2c2   : > { %s1299_s19 = scalar_lea.vmem %s1687_s30, 128 }
 0x2c3   : > { %p1300_p8 = scmp.ne.s32.totalorder %s1687_s30, %s1299_s19 }
 0x2c5   : > { %p1301_p1 = pnand %p1300_p8, %p1747_p0 }
 0x2c7   : > { %p1302_p3 = pneg %p1301_p1 }
 0x338   : > { %v390_v23 = vpop.xlane.xlu0 %389 }
 0x339   : > { %v391_v24 = vsub.f32 %v387_v18, %v390_v23 }
 0x33b   : > { %v392_v25 = vmul.f32 1.442695, %v391_v24 }
 0x33c   : > { %v674_v37 = vpop.permute.xlu0 %673 }
 0x33d   : > { %1197 = vpow2.f32 %v392_v25  ;;  %v679_v39 = vsel %vm340_vm2, %v674_v37, 0  ;;  %v1195_v37 = vld [vmem:[#allocation7] sm:$0xff]  }
 0x347   : > { %v1198_v26 = vpop.eup %1197 }
 0x348   : > { %v394_v27 = vsel %vm340_vm2, %v1198_v26, 0.0 }
 0x349   : > { %395 = vadd.xlane.f32.xlu1 %v394_v27 }
 0x35a   : > { %449 = vrot.lane.b32.xlu1 %v1613_v9, %s1382_s5 }
 0x35e   : > { %562 = vrot.lane.b32.xlu1 %v1613_v9, %s1383_s6 }
 0x362   : > { %560 = vrot.lane.b32.xlu1 %v1613_v9, %s1384_s26  ;;  %s1685_s26 = scalar_lea.hbm %s1733_s4, %s1003_s23 }
 0x366   : > { %671 = vrot.lane.b32.xlu1 %v1613_v9, %s1385_s10  ;;  %s869_s10 = scalar_lea.sflag [#allocation4], %s1587_s29 }
 0x3d6   : > { %v396_v29 = vpop.xlane.xlu1 %395 }
 0x3d7   : > { %1199 = vrcp.f32 %v396_v29 }
 0x3da   : > { %v450_v33 = vpop.permute.xlu1 %449 }
 0x3de   : > { %v563_v35 = vpop.permute.xlu1 %562 }
 0x3df   : > { %v568_v36 = vsel %vm340_vm2, %v563_v35, 0 }
 0x3e1   : > { %v1200_v30 = vpop.eup %1199 }
 0x3e2   : > { %v398_v31 = vmul.f32 %v1200_v30, %v1198_v26  ;;  %v561_v38 = vpop.permute.xlu1 %560 }
 0x3e4   : > { %v399_v32 = vpack.c.bf16 %v398_v31, %v398_v31 }
 0x3e6   : > { %1057 = vmatmul.mubr.msk.bf16.vlgmr.msra.gmra.mrb[4].mxu1 %vm340_vm2, %v399_v32  ;;  %v672_v40 = vpop.permute.xlu1 %671 }
 0x3e7   : > { %1061 = vmatpush3.bf16.xpose.msra.mxu1 %v457_v34  ;;  %1062 = vmatprep.mubr.msk.bf16.mxu1 %vm1377_vm0, %v1376_v0 }
 0x3e8   : > { %1072 = vmatprep.subr.bf16.mxu1 %v1376_v0 }
 0x3ee   : > { %1063 = vmatmul.mubr.msk.bf16.vlgmr.msra.gmra.mrb[8].mxu1 %vm340_vm2, %v450_v33 }
 0x3ef   : > { %1073 = vmatpush3.bf16.xpose.msra.mxu1 %v568_v36  ;;  %1074 = vmatprep.mubr.msk.bf16.mxu1 %vm1377_vm0, %v1376_v0 }
 0x3f0   : > { %1084 = vmatprep.subr.bf16.mxu1 %v1376_v0 }
 0x3f6   : > { %1075 = vmatmul.mubr.msk.bf16.vlgmr.msra.gmra.mrb[12].mxu1 %vm340_vm2, %v561_v38  ;;  %v1196_v38 = vld [vmem:[#allocation7 + $0x8] sm:$0xff]  }
 0x3f7   : > { %1085 = vmatpush3.bf16.xpose.msra.mxu1 %v679_v39  ;;  %1086 = vmatprep.mubr.msk.bf16.mxu1 %vm1377_vm0, %v1376_v0 }
 0x3f8   : > { %1096 = vmatprep.subr.bf16.mxu1 %v1376_v0 }
 0x3fe   : > { %1087 = vmatmul.mubr.msk.bf16.vlgmr.msra.gmra.mrb[16].mxu1 %vm340_vm2, %v672_v40 }
 0x3ff   : > { %1100 = vmatprep.mubr.msk.bf16.mxu1 %vm1377_vm0, %v1376_v0  ;;  %1097 = vmatpush3.bf16.msra.mxu1 %v1195_v37 }
 0x400   : > { %1098 = vmatprep.subr.bf16.mxu1 %v1376_v0 }
 0x403   : > { %1099 = vmatpush3.bf16.msra.mxu1 %v1196_v38 }
 0x4b9   : > { %v1651_v41 = vpop.f32.mrb[4].mxu1 }
 0x4ba   : > { %v1058_v42 = vpop.f32.mrb[5].mxu1 }
 0x4bb   : > { %v446_v43 = vpop.f32.mrb[6].mxu1 }
 0x4bc   : > { %v1059_v44 = vpop.f32.mrb[7].mxu1 }
 0x4c1   : > { %v493_v45 = vpop.f32.mrb[8].mxu1 }
 0x4c2   : > { %v499_v46 = vmul.f32 0.17677669, %v493_v45  ;;  %v1064_v47 = vpop.f32.mrb[9].mxu1 }
 0x4c3   : > { %v496_v48 = vpop.f32.mrb[10].mxu1 }
 0x4c4   : > { %v1065_v49 = vpop.f32.mrb[11].mxu1  ;;  %v500_v50 = vsel %vm340_vm2, %v499_v46, -inf }
 0x4c5   : > { %501 = vmax.xlane.f32.xlu1 %v500_v50 }
 0x4c9   : > { %v604_v51 = vpop.f32.mrb[12].mxu1 }
 0x4ca   : > { %v610_v52 = vmul.f32 0.17677669, %v604_v51  ;;  %v1076_v53 = vpop.f32.mrb[13].mxu1 }
 0x4cb   : > { %v607_v54 = vpop.f32.mrb[14].mxu1 }
 0x4cc   : > { %v1077_v55 = vpop.f32.mrb[15].mxu1  ;;  %v611_v56 = vsel %vm340_vm2, %v610_v52, -inf  ;;  %v998_v54 = vld [vmem:[%s1732_s3] ss:$0 sm:$0xff] }
 0x4cd   : > { %612 = vmax.xlane.f32.xlu0 %v611_v56 }
 0x4d1   : > { %v715_v57 = vpop.f32.mrb[16].mxu1 }
 0x4d2   : > { %v721_v58 = vmul.f32 0.17677669, %v715_v57  ;;  %v1088_v59 = vpop.f32.mrb[17].mxu1 }
 0x4d3   : > { %v718_v60 = vpop.f32.mrb[18].mxu1 }
 0x4d4   : > { %v1089_v61 = vpop.f32.mrb[19].mxu1  ;;  %v722_v62 = vsel %vm340_vm2, %v721_v58, -inf }
 0x4d5   : > { %723 = vmax.xlane.f32.xlu1 %v722_v62 }
 0x552   : > { %v502_v63 = vpop.xlane.xlu1 %501 }
 0x553   : > { %v503_v1 = vsub.f32 %v499_v46, %v502_v63 }
 0x555   : > { %v504_v2 = vmul.f32 1.442695, %v503_v1 }
 0x557   : > { %1201 = vpow2.f32 %v504_v2 }
 0x55a   : > { %v613_v11 = vpop.xlane.xlu0 %612 }
 0x55b   : > { %v614_v12 = vsub.f32 %v610_v52, %v613_v11 }
 0x55d   : > { %v615_v13 = vmul.f32 1.442695, %v614_v12 }
 0x561   : > { %v1202_v3 = vpop.eup %1201 }
 0x562   : > { %v724_v4 = vpop.xlane.xlu1 %723  ;;  %v506_v5 = vsel %vm340_vm2, %v1202_v3, 0.0 }
 0x563   : > { %v725_v6 = vsub.f32 %v721_v58, %v724_v4  ;;  %507 = vadd.xlane.f32.xlu1 %v506_v5 }
 0x565   : > { %v726_v7 = vmul.f32 1.442695, %v725_v6 }
 0x567   : > { %1203 = vpow2.f32 %v726_v7 }
 0x568   : > { %1205 = vpow2.f32 %v615_v13 }
 0x571   : > { %v1204_v8 = vpop.eup %1203 }
 0x572   : > { %v728_v10 = vsel %vm340_vm2, %v1204_v8, 0.0  ;;  %v1206_v14 = vpop.eup %1205 }
 0x573   : > { %729 = vadd.xlane.f32.xlu0 %v728_v10  ;;  %v617_v15 = vsel %vm340_vm2, %v1206_v14, 0.0 }
 0x574   : > { %512 = vrot.lane.b32.xlu1 %v1613_v9, %s1386_s24  ;;  %s1392_s24 = smov [#allocation8]  }
 0x589   : > { %623 = vrot.lane.b32.xlu0 %v1613_v9, %s1387_s20  ;;  %s1303_s20 = sshll.u32 %s1392_s24, 4  ;;  %s1304_s20 = int_to_ptr.vmem [resolvable:$false] %s1303_s20 }
 0x58a   : > { %p1306_p7 = scmp.lt.s32.totalorder %s1687_s30, %s1304_s20 }
 0x598   : > { %618 = vadd.xlane.f32.xlu1 %v617_v15 }
 0x5a9   : > { %734 = vrot.lane.b32.xlu1 %v1613_v9, %s1388_s28  ;;  %s1305_s28 = scalar_lea.vmem %s1304_s20, 256 }
 0x5aa   : > { %p1307_p9 = scmp.lt.s32.totalorder %s1305_s28, %s1299_s19 }
 0x5ac   : > { %p1308_p12 = por %p1307_p9, %p1306_p7 }
 0x5ae   : > { %p1309_p2 = pnand %p1308_p12, %p1302_p3 }
 0x5f0   : > { %v508_v16 = vpop.xlane.xlu1 %507 }
 0x5f1   : > { %1207 = vrcp.f32 %v508_v16 }
 0x5f4   : > { %v513_v17 = vpop.permute.xlu1 %512 }
 0x5f5   : > { %v518_v18 = vsel %vm405_vm3, %v513_v17, 0 }
 0x5f6   : > { %1067 = vmatpush3.bf16.msra.mxu0 %v518_v18 }
 0x5f7   : > { %1078 = vmatprep.subr.bf16.mxu0 %v1376_v0 }
 0x5fb   : > { %v1208_v19 = vpop.eup %1207 }
 0x5fc   : > { %v510_v20 = vmul.f32 %v1208_v19, %v1202_v3 }
 0x5fe   : > { %v511_v21 = vpack.c.bf16 %v510_v20, %v510_v20 }
 0x600   : > { %v730_v22 = vpop.xlane.xlu0 %729  ;;  %1069 = vmatmul.mubr.msk.bf16.vlgmr.msra.gmra.mrb[4].mxu0 %vm340_vm2, %v511_v21 }
 0x601   : > { %1080 = vmatprep.mubr.msk.bf16.mxu0 %vm1377_vm0, %v1376_v0 }
 0x604   : > { %v624_v23 = vpop.permute.xlu0 %623 }
 0x605   : > { %v629_v9 = vsel %vm405_vm3, %v624_v23, 0 }
 0x606   : > { %1079 = vmatpush3.bf16.msra.mxu0 %v629_v9 }
 0x607   : > { %1090 = vmatprep.subr.bf16.mxu0 %v1376_v0 }
 0x625   : > { %v619_v24 = vpop.xlane.xlu1 %618 }
 0x626   : > { %1209 = vrcp.f32 %v619_v24 }
 0x627   : > { %1211 = vrcp.f32 %v730_v22 }
 0x629   : > { %v735_v27 = vpop.permute.xlu1 %734 }
 0x62a   : > { %v740_v30 = vsel %vm405_vm3, %v735_v27, 0 }
 0x630   : > { %v1210_v25 = vpop.eup %1209 }
 0x631   : > { %v621_v26 = vmul.f32 %v1210_v25, %v1206_v14  ;;  %v1212_v29 = vpop.eup %1211 }
 0x632   : > { %v732_v31 = vmul.f32 %v1212_v29, %v1204_v8 }
 0x633   : > { %v622_v28 = vpack.c.bf16 %v621_v26, %v621_v26 }
 0x634   : > { %v733_v32 = vpack.c.bf16 %v732_v31, %v732_v31 }
 0x635   : > { %1081 = vmatmul.mubr.msk.bf16.vlgmr.msra.gmra.mrb[8].mxu0 %vm340_vm2, %v622_v28 }
 0x636   : > { %1091 = vmatpush3.bf16.msra.mxu0 %v740_v30  ;;  %1092 = vmatprep.mubr.msk.bf16.mxu0 %vm1377_vm0, %v1376_v0 }
 0x63d   : > { %1093 = vmatmul.mubr.msk.bf16.vlgmr.msra.gmra.mrb[12].mxu0 %vm340_vm2, %v733_v32 }
 0x6d3   : > { %v554_v33 = vpop.f32.mrb[4].mxu0 }
 0x6d4   : > { %783 = vrot.lane.b32.xlu1 %v554_v33, %s1389_s11  ;;  %v1070_v34 = vpop.f32.mrb[5].mxu0 }
 0x6d5   : > { %v557_v35 = vpop.f32.mrb[6].mxu0 }
 0x6d6   : > { %v1071_v36 = vpop.f32.mrb[7].mxu0 }
 0x708   : > { %v665_v39 = vpop.f32.mrb[8].mxu0 }
 0x709   : > { %787 = vrot.lane.b32.xlu0 %v665_v39, %s1390_s12  ;;  %v1082_v40 = vpop.f32.mrb[9].mxu0 }
 0x70a   : > { %v668_v42 = vpop.f32.mrb[10].mxu0 }
 0x70b   : > { %v1083_v43 = vpop.f32.mrb[11].mxu0 }
 0x710   : > { %v776_v44 = vpop.f32.mrb[12].mxu0 }
 0x711   : > { %791 = vrot.lane.b32.xlu1 %v776_v44, %s1391_s25  ;;  %v1094_v45 = vpop.f32.mrb[13].mxu0 }
 0x712   : > { %v779_v46 = vpop.f32.mrb[14].mxu0 }
 0x713   : > { %v1095_v47 = vpop.f32.mrb[15].mxu0 }
 0x746   : > { %v784_v48 = vpop.permute.xlu1 %783 }
 0x747   : > { %v794_v0 = vsel %vm340_vm2, %v1651_v41, %v784_v48 }
 0x77b   : > { %v788_v49 = vpop.permute.xlu0 %787 }
 0x77c   : > { %v796_v50 = vsel %vm795_vm4, %v794_v0, %v788_v49 }
 0x783   : > { %v792_v51 = vpop.permute.xlu1 %791 }
 0x784   : > { %v798_v52 = vsel %vm797_vm5, %v796_v50, %v792_v51 }
 0x785   : > { %v799_v53 = vpack.c.bf16 %v798_v52, %v798_v52 }
 0x787   : > { %1101 = vmatmul.mubr.msk.bf16.vlgmr.msra.gmra.mrb[20].mxu1 %vm823_vm6, %v799_v53 }
 0x85a   : > { %v861_v55 = vpop.f32.mrb[20].mxu1 }
 0x85b   : > { %v862_v56 = vadd.f32 %v998_v54, %v861_v55  ;;  %v1102_v57 = vpop.f32.mrb[21].mxu1 }
 0x85c   : > { %v864_v41 = vpop.f32.mrb[22].mxu1 }
 0x85d   : > { %v1103_v58 = vpop.f32.mrb[23].mxu1  ;;  %867 = vst.msk [vmem:[%s241_s27] sm:$0xff] %vm823_vm6, %v862_v56 }
 0x85e   : > { %1312 = shalt.err (!%p1309_p2)
}
 0x85f   : > { %s1313_s29 = scalar_lea.hbm %s1685_s26, 128  ;;  %s1317_s25 = scalar_lea.hbm %s1733_s4, 256 }
 0x860   : > { %p1314_p13 = scmp.ne.s32.totalorder %s1685_s26, %s1313_s29  ;;  %p1318_p4 = scmp.lt.u32.totalorder %s1685_s26, %s1733_s4 }
 0x861   : > { %p1319_p5 = scmp.lt.u32.totalorder %s1317_s25, %s1313_s29  ;;  %p1321_p8 = scmp.lt.u32.totalorder %s1313_s29, %s1685_s26 }
 0x862   : > { %p1315_p6 = pnand %p1314_p13, %p1747_p0 }
 0x863   : > { %p1320_p11 = por %p1319_p5, %p1318_p4 }
 0x864   : > { %p1316_p10 = pneg %p1315_p6 }
 0x865   : > { %p1322_p1 = por %p1321_p8, %p1320_p11 }
 0x867   : > { %p1323_p3 = pnand %p1322_p1, %p1316_p10 }
 0x869   : > { %1326 = shalt.err (!%p1323_p3)
}
 0x86a   : > { %1114 = dma.vmem_to_hbm [thread:$0]  (%p1747_p0), %s1687_s30, 128, %s1685_s26, %s869_s10  }
 0x86b PF: > { %s894_s21 = sand.u32 1, %s1357_s15   ;;  %p1748_p7 = scmp.ne.s32.totalorder %s1738_s22, 0 }
 0x86c   : > { %p1749_p9 = scmp.ge.s32.totalorder %s1369_s18, 2  ;;  %s895_s23 = scalar_lea.sflag [#allocation4], %s894_s21 }
 0x86e   : > { %p1128_p12 = pnand %p1749_p9, %p1748_p7 }
 0x870   : > { %1352 = dma.done.wait (!%p1128_p12), %s895_s23, 128  }
 0x871   : > { %1354 = vsyncadd (!%p1128_p12), %s895_s23, 4294967168  ;;  %p18_p2 = scmp.ge.s32.totalorder %s1528_s9, 4   ;;  %s1750_s15 = smov %s1361_s16 }
 0x872   : > { %s1751_s16 = smov %s1365_s17  ;;  %s1752_s17 = smov %s1544_s14 }
 0x873   : > { %s1753_s18 = smov %s1528_s9  ;;  %20 = sbr.rel (!%p18_p2) target bundleno = 6 (0x6), region = 89 }
 0x87a   :  { %900 = vsyncpa [#allocation3], 1 }
 0x87b   :  { %902 = vsyncpa [#allocation3 + $0x1], 1 }
 0x87c   :  { %903 = vsyncpa [#allocation6], 1 }
 0x87d   :  { %904 = vsyncpa [#allocation4], 1 }
 0x87e   :  { %906 = vsyncpa [#allocation4 + $0x1], 1 }

</bundles_post_ra>
